<compile_context>
chip_gen: v7x
topology: tpu7x:2x2x1
jax: 0.10.0
libtpu: 0.0.40
codegen_flags: <defaults>
</compile_context>

<pallas_src>
import functools

import jax
import jax.numpy as jnp
from jax import lax
from jax.experimental import pallas as pl
from jax.experimental.pallas import tpu as pltpu


def _cdiv(a, b):
    return (a + b - 1) // b


def _round_up(x, m):
    return _cdiv(x, m) * m


def _pad2(a, rows, cols):
    pr, pc = rows - a.shape[0], cols - a.shape[1]
    if pr or pc:
        a = jnp.pad(a, ((0, pr), (0, pc)))
    return a


def _dnorm2_kernel(gamma_ref, x_ref, y_ref, xsq_ref, ysq_ref, o_ref,
                   *, apply_exp, rhs_transposed):
    """One (tm, tn) tile of dnorm2 = -2 X Y^T + |x|^2 + |y|^2 (optionally exp'd).

    The raw dot product accumulates into the resident output tile; -2 (and
    gamma when fused) are applied only in the last-K epilogue.
    """
    k = pl.program_id(2)

    @pl.when(k == 0)
    def _():
        o_ref[...] = jnp.zeros_like(o_ref)

    x = x_ref[...]
    y = y_ref[...]
    if rhs_transposed:
        # y is a (tk, tn) tile of Y^T -> plain MXU matmul.
        o_ref[...] += jnp.dot(x, y, preferred_element_type=jnp.float32)
    else:
        # y is a (tn, tk) tile of Y -> contract both last dims (X @ Y^T).
        o_ref[...] += lax.dot_general(
            x, y, (((1,), (1,)), ((), ())),
            preferred_element_type=jnp.float32)

    @pl.when(k == pl.num_programs(2) - 1)
    def _():
        acc = o_ref[...]          # sum_k X Y^T
        xs = xsq_ref[...]         # (tm, 1)  precomputed |x|^2
        ys = ysq_ref[...]         # (1, tn)  precomputed |y|^2
        if apply_exp:  # static Python flag -> fused K = exp(-gamma * dnorm2)
            g = gamma_ref[0]
            # gamma scaling applied to the tiny vectors; only the broadcast
            # adds + one full-tile mul + exp touch the (tm, tn) tile.
            o_ref[...] = jnp.exp((2.0 * g) * acc + (-g) * xs + (-g) * ys)
        else:
            o_ref[...] = (xs - 2.0 * acc) + ys


def _exp_kernel(gamma_ref, d_ref, o_ref):
    """K = exp(-gamma * dnorm2); gamma is an SMEM scalar."""
    o_ref[...] = jnp.exp(-gamma_ref[0] * d_ref[...])


def _dnorm2_call(Xp, Yp, xsqp, ysqp, gamma_arr, *,
                 apply_exp, rhs_transposed, tm, tn, tk):
    Np, Dp = Xp.shape
    Mp = ysqp.shape[1]
    grid = (Np // tm, Mp // tn, Dp // tk)

    if rhs_transposed:
        y_spec = pl.BlockSpec((tk, tn), lambda i, j, k: (k, j))   # Y^T tile
    else:
        y_spec = pl.BlockSpec((tn, tk), lambda i, j, k: (j, k))   # Y tile

    # Explicit scoped-VMEM limit (v5e defaults to only 16 MiB).
    vmem_need = 4 * 2 * (tm * tk + tk * tn + tm * tn) + (1 << 20)
    vmem_limit = int(min(48 << 20, max(2 * vmem_need, 16 << 20)))

    bytes_in = Xp.size * Xp.dtype.itemsize + Yp.size * Yp.dtype.itemsize
    cost = pl.CostEstimate(
        flops=2 * Np * Mp * Dp + 3 * Np * Mp,
        transcendentals=Np * Mp if apply_exp else 0,
        bytes_accessed=bytes_in + 4 * Np * Mp,
    )
    return pl.pallas_call(
        functools.partial(_dnorm2_kernel, apply_exp=apply_exp,
                          rhs_transposed=rhs_transposed),
        out_shape=jax.ShapeDtypeStruct((Np, Mp), jnp.float32),
        grid_spec=pltpu.PrefetchScalarGridSpec(
            num_scalar_prefetch=0,
            grid=grid,
            in_specs=[
                pl.BlockSpec(memory_space=pltpu.SMEM),            # gamma scalar
                pl.BlockSpec((tm, tk), lambda i, j, k: (i, k)),   # X tile
                y_spec,                                           # Y / Y^T tile
                pl.BlockSpec((tm, 1), lambda i, j, k: (i, 0)),    # |x|^2
                pl.BlockSpec((1, tn), lambda i, j, k: (0, j)),    # |y|^2
            ],
            out_specs=pl.BlockSpec((tm, tn), lambda i, j, k: (i, j)),
        ),
        compiler_params=pltpu.CompilerParams(
            dimension_semantics=("parallel", "parallel", "arbitrary"),
            vmem_limit_bytes=vmem_limit,
        ),
        cost_estimate=cost,
    )(gamma_arr, Xp, Yp, xsqp, ysqp)


def _exp_call(gamma, d_pad, *, tm, tn):
    Np, Mp = d_pad.shape
    gamma_arr = jnp.reshape(gamma, (1,)).astype(jnp.float32)
    return pl.pallas_call(
        _exp_kernel,
        out_shape=jax.ShapeDtypeStruct((Np, Mp), jnp.float32),
        grid_spec=pltpu.PrefetchScalarGridSpec(
            num_scalar_prefetch=0,
            grid=(Np // tm, Mp // tn),
            in_specs=[
                pl.BlockSpec(memory_space=pltpu.SMEM),
                pl.BlockSpec((tm, tn), lambda i, j: (i, j)),
            ],
            out_specs=pl.BlockSpec((tm, tn), lambda i, j: (i, j)),
        ),
        compiler_params=pltpu.CompilerParams(
            dimension_semantics=("parallel", "parallel"),
        ),
        # Reuse the dnorm2 HBM buffer for the kernel matrix (no second Np x Mp
        # allocation; dnorm2 is dead after this call).
        input_output_aliases={1: 0},
        cost_estimate=pl.CostEstimate(
            flops=Np * Mp, transcendentals=Np * Mp, bytes_accessed=8 * Np * Mp
        ),
    )(gamma_arr, d_pad)


@functools.partial(jax.jit, static_argnames=("sigma", "tm", "tn", "tk", "use_bf16"))
def rbf_forward(X, Y, sigma=None, tm=256, tn=512, tk=None, use_bf16=False):
    """Pallas implementation of RBF.forward(X, Y)."""
    N, D = X.shape
    M, D2 = Y.shape
    assert D == D2, "feature dims must match"
    assert tm % 8 == 0 and tn % 128 == 0

    Xf = X.astype(jnp.float32)
    Yf = Y.astype(jnp.float32)

    # Row / column squared norms computed ONCE here (cheap XLA reduce) instead
    # of re-reducing X and Y tiles on every (i, j, k) grid point.
    xsq = jnp.sum(Xf * Xf, axis=1, keepdims=True)       # (N, 1)
    ysq = jnp.sum(Yf * Yf, axis=1, keepdims=True).T     # (1, M)

    # ---- tile selection ---------------------------------------------------
    tm_ = min(tm, _round_up(N, 8))
    tn_ = min(tn, _round_up(M, 128))
    Np = _round_up(N, tm_)
    Mp = _round_up(M, tn_)
    # v7x megacore: if the (i, j) grid collapses to a single tile, split j so
    # the second TensorCore gets work (tn_ stays >= 128 -> lane-dense stores).
    if (Np // tm_) * (Mp // tn_) == 1 and Mp >= 256:
        tn_ = 128
    # Size tk so the double-buffered X/Y tiles fill ~10 MiB: amortizes the
    # per-step pipeline overhead in the small-N / large-D (SVGD) regime.
    budget = 10 * 1024 * 1024
    tk_cap = max(128, ((budget // (2 * 4 * (tm_ + tn_))) // 128) * 128)
    if tk is not None:
        tk_cap = min(tk_cap, max(128, (tk // 128) * 128))
    tk_cap = min(tk_cap, 4096)
    d128 = _round_up(D, 128)
    nk = _cdiv(d128, tk_cap)
    tk_ = _round_up(_cdiv(D, nk), 128)
    Dp = nk * tk_

    # ---- padding / layout ---------------------------------------------------
    Xp = _pad2(Xf, Np, Dp)
    xsqp = _pad2(xsq, Np, 1)
    ysqp = _pad2(ysq, 1, Mp)

    # Pre-transpose Y only when the i grid has >1 block (Y^T is then re-read
    # once per i block and the one-time HBM transpose pays off).  Otherwise Y
    # is read exactly once, so keep it (M, D) and contract on the last dims.
    rhs_transposed = (Np // tm_) > 1
    if rhs_transposed:
        Yp = _pad2(Yf.T, Dp, Mp)        # (D, M): lane-dense RHS
    else:
        Yp = _pad2(Yf, Mp, Dp)          # (M, D): no extra HBM transpose pass

    if use_bf16:
        # TODO(synk): bf16 MXU inputs lose accuracy when Y ~= X (catastrophic
        # cancellation in -2XY + |x|^2 + |y|^2) -- keep off for SVGD inputs.
        Xp = Xp.astype(jnp.bfloat16)
        Yp = Yp.astype(jnp.bfloat16)

    if sigma is None:
        # Two-pass path: dnorm2, median heuristic in plain JAX glue, tiled exp.
        dummy = jnp.zeros((1,), jnp.float32)
        d_pad = _dnorm2_call(Xp, Yp, xsqp, ysqp, dummy, apply_exp=False,
                             rhs_transposed=rhs_transposed, tm=tm_, tn=tn_, tk=tk_)
        d = d_pad[:N, :M]
        # TODO(synk): median has no clean Pallas primitive; computed with jnp.
        h = jnp.median(d) / (2.0 * jnp.log(jnp.float32(N) + 1.0))
        sigma_v = jnp.sqrt(h)
        gamma = 1.0 / (1e-8 + 2.0 * sigma_v**2)
        k_pad = _exp_call(gamma, d_pad, tm=tm_, tn=tn_)
        return k_pad[:N, :M]

    # Static sigma: exp fused into the matmul epilogue, single kernel launch.
    gamma = 1.0 / (1e-8 + 2.0 * float(sigma) ** 2)
    gamma_arr = jnp.full((1,), gamma, jnp.float32)
    k_pad = _dnorm2_call(Xp, Yp, xsqp, ysqp, gamma_arr, apply_exp=True,
                         rhs_transposed=rhs_transposed, tm=tm_, tn=tn_, tk=tk_)
    return k_pad[:N, :M]


def _reference(X, Y, sigma=None):
    X = X.astype(jnp.float32)
    Y = Y.astype(jnp.float32)
    XY = X @ Y.T
    d = (
        -2.0 * XY
        + jnp.sum(X * X, axis=1, keepdims=True)
        + jnp.sum(Y * Y, axis=1, keepdims=True).T
    )
    if sigma is None:
        h = jnp.median(d) / (2.0 * jnp.log(jnp.float32(X.shape[0]) + 1.0))
        sigma = jnp.sqrt(h)
    gamma = 1.0 / (1e-8 + 2.0 * sigma**2)
    return jnp.exp(-gamma * d)


if __name__ == "__main__":
    key = jax.random.PRNGKey(0)
    kx, ky, kz, kw = jax.random.split(key, 4)

    # 1) SVGD-sized problem: 16 particles, 256-dim parameters; median sigma.
    N, D = 16, 256
    X = jax.random.normal(kx, (N, D), dtype=jnp.float32)
    Y = X + 0.1 * jax.random.normal(ky, (N, D), dtype=jnp.float32)
    K = rbf_forward(X, Y, sigma=None)
    jax.block_until_ready(K)
    assert K.shape == (N, N)
    assert jnp.allclose(K, _reference(X, Y, None), atol=1e-4, rtol=1e-4)

    # 2) Fixed sigma: exp fused into the matmul epilogue (single kernel).
    K2 = rbf_forward(X, Y, sigma=1.5)
    jax.block_until_ready(K2)
    assert jnp.allclose(K2, _reference(X, Y, 1.5), atol=1e-4, rtol=1e-4)

    # 3) Ragged shapes exercise the padding path (N != M, D not /128).
    N2, M2, D2 = 16, 24, 300
    X2 = jax.random.normal(kz, (N2, D2), dtype=jnp.float32)
    Y2 = jax.random.normal(ky, (M2, D2), dtype=jnp.float32)
    K3 = rbf_forward(X2, Y2, sigma=None)
    jax.block_until_ready(K3)
    assert K3.shape == (N2, M2)
    assert jnp.allclose(K3, _reference(X2, Y2, None), atol=1e-4, rtol=1e-4)

    # 4) Multi-i-block (pre-transposed Y^T) + multi-K streaming path.
    N3, M3, D3 = 320, 272, 4500
    X3 = jax.random.normal(kx, (N3, D3), dtype=jnp.float32)
    Y3 = jax.random.normal(kw, (M3, D3), dtype=jnp.float32)
    K4 = rbf_forward(X3, Y3, sigma=None)
    jax.block_until_ready(K4)
    assert K4.shape == (N3, M3)
    assert jnp.allclose(K4, _reference(X3, Y3, None), atol=5e-4, rtol=5e-3)

    # 5) Single-(i,j)-tile case with M >= 256: j split for v7x megacore;
    #    fixed sigma -> fused exp, multi-j grid.
    N4, M4, D4 = 16, 300, 256
    X4 = jax.random.normal(kz, (N4, D4), dtype=jnp.float32)
    Y4 = jax.random.normal(ky, (M4, D4), dtype=jnp.float32)
    K5 = rbf_forward(X4, Y4, sigma=2.0)
    jax.block_until_ready(K5)
    assert K5.shape == (N4, M4)
    assert jnp.allclose(K5, _reference(X4, Y4, 2.0), atol=1e-4, rtol=1e-4)

    # 6) Optional bf16 MXU path (far-apart points only; looser tolerance).
    K6 = rbf_forward(X2, Y2, sigma=None, use_bf16=True)
    jax.block_until_ready(K6)
    assert jnp.allclose(K6, _reference(X2, Y2, None), atol=2e-2, rtol=2e-2)

    print("KERNEL_OK")
</pallas_src>

<mosaic_0001>
module attributes {stable_mosaic.version = 11 : i64} {
  func.func @_dnorm2_kernel(%arg0: i32, %arg1: i32, %arg2: i32, %arg3: memref<1xf32, #tpu.memory_space<smem>>, %arg4: memref<16x256xf32, #tpu.memory_space<vmem>>, %arg5: memref<128x256xf32, #tpu.memory_space<vmem>>, %arg6: memref<16x1xf32, #tpu.memory_space<vmem>>, %arg7: memref<1x128xf32, #tpu.memory_space<vmem>>, %arg8: memref<16x128xf32, #tpu.memory_space<vmem>>) attributes {dimension_semantics = [#tpu.dimension_semantics<parallel>, #tpu.dimension_semantics<parallel>, #tpu.dimension_semantics<arbitrary>], iteration_bounds = array<i64: 1, 1, 1>, scalar_prefetch = 0 : i64, scratch_operands = 0 : i64, tpu.core_type = #tpu.core_type<tc>, window_params = [{transform_indices = @transform_0, window_bounds = array<i64: 1>}, {transform_indices = @transform_1, window_bounds = array<i64: 16, 256>}, {transform_indices = @transform_2, window_bounds = array<i64: 128, 256>}, {transform_indices = @transform_3, window_bounds = array<i64: 16, 1>}, {transform_indices = @transform_4, window_bounds = array<i64: 1, 128>}, {transform_indices = @transform_5, window_bounds = array<i64: 16, 128>}]} {
    %c0_i32 = arith.constant 0 : i32
    %0 = arith.cmpi eq, %arg2, %c0_i32 : i32
    %1 = arith.extui %0 : i1 to i32
    %c0_i32_0 = arith.constant 0 : i32
    %2 = arith.cmpi ne, %1, %c0_i32_0 : i32
    scf.if %2 {
      %cst_10 = arith.constant 0.000000e+00 : f32
      %12 = vector.broadcast %cst_10 : f32 to vector<16x128xf32>
      %c0_11 = arith.constant 0 : index
      %c0_12 = arith.constant 0 : index
      %13 = vector.load %arg8[%c0_11, %c0_12] : memref<16x128xf32, #tpu.memory_space<vmem>>, vector<16x128xf32>
      tpu.vector_store %arg8[%c0_11, %c0_12], %12 {strides = array<i32>} : memref<16x128xf32, #tpu.memory_space<vmem>>, vector<16x128xf32>,
    } else {
    }
    %c0 = arith.constant 0 : index
    %c0_1 = arith.constant 0 : index
    %3 = vector.load %arg4[%c0, %c0_1] : memref<16x256xf32, #tpu.memory_space<vmem>>, vector<16x256xf32>
    %c0_2 = arith.constant 0 : index
    %c0_3 = arith.constant 0 : index
    %4 = vector.load %arg5[%c0_2, %c0_3] : memref<128x256xf32, #tpu.memory_space<vmem>>, vector<128x256xf32>
    %c0_4 = arith.constant 0 : index
    %c0_5 = arith.constant 0 : index
    %5 = vector.load %arg8[%c0_4, %c0_5] : memref<16x128xf32, #tpu.memory_space<vmem>>, vector<16x128xf32>
    %cst = arith.constant dense<0.000000e+00> : vector<16x128xf32>
    %6 = tpu.matmul %3, %4, %cst {dimension_numbers = #tpu.dot_dimension_numbers<[1], [1], [0], [0], [0, 0, 1, 0], [], []>} : vector<16x256xf32>, vector<128x256xf32>, vector<16x128xf32> -> vector<16x128xf32>
    %7 = arith.addf %5, %6 : vector<16x128xf32>
    %c0_6 = arith.constant 0 : index
    %c0_7 = arith.constant 0 : index
    %8 = vector.load %arg8[%c0_6, %c0_7] : memref<16x128xf32, #tpu.memory_space<vmem>>, vector<16x128xf32>
    tpu.vector_store %arg8[%c0_6, %c0_7], %7 {strides = array<i32>} : memref<16x128xf32, #tpu.memory_space<vmem>>, vector<16x128xf32>,
    %c0_i32_8 = arith.constant 0 : i32
    %9 = arith.cmpi eq, %arg2, %c0_i32_8 : i32
    %10 = arith.extui %9 : i1 to i32
    %c0_i32_9 = arith.constant 0 : i32
    %11 = arith.cmpi ne, %10, %c0_i32_9 : i32
    scf.if %11 {
      %c0_10 = arith.constant 0 : index
      %c0_11 = arith.constant 0 : index
      %12 = vector.load %arg8[%c0_10, %c0_11] : memref<16x128xf32, #tpu.memory_space<vmem>>, vector<16x128xf32>
      %c0_12 = arith.constant 0 : index
      %c0_13 = arith.constant 0 : index
      %13 = vector.load %arg6[%c0_12, %c0_13] : memref<16x1xf32, #tpu.memory_space<vmem>>, vector<16x1xf32>
      %c0_14 = arith.constant 0 : index
      %c0_15 = arith.constant 0 : index
      %14 = vector.load %arg7[%c0_14, %c0_15] : memref<1x128xf32, #tpu.memory_space<vmem>>, vector<1x128xf32>
      %cst_16 = arith.constant 2.000000e+00 : f32
      %15 = vector.broadcast %cst_16 : f32 to vector<16x128xf32>
      %16 = arith.mulf %15, %12 : vector<16x128xf32>
      %17 = vector.broadcast %13 : vector<16x1xf32> to vector<16x128xf32>
      %18 = arith.subf %17, %16 : vector<16x128xf32>
      %19 = vector.broadcast %14 : vector<1x128xf32> to vector<16x128xf32>
      %20 = arith.addf %18, %19 : vector<16x128xf32>
      %c0_17 = arith.constant 0 : index
      %c0_18 = arith.constant 0 : index
      %21 = vector.load %arg8[%c0_17, %c0_18] : memref<16x128xf32, #tpu.memory_space<vmem>>, vector<16x128xf32>
      tpu.vector_store %arg8[%c0_17, %c0_18], %20 {strides = array<i32>} : memref<16x128xf32, #tpu.memory_space<vmem>>, vector<16x128xf32>,
    } else {
    }
    return
  }
  func.func @transform_0(%arg0: i32, %arg1: i32, %arg2: i32) -> i32 {
    %c0_i32 = arith.constant 0 : i32
    %c0_i32_0 = arith.constant 0 : i32
    return %c0_i32 : i32
  }
  func.func @transform_1(%arg0: i32, %arg1: i32, %arg2: i32) -> (i32, i32) {
    %c0_i32 = arith.constant 0 : i32
    return %arg0, %arg2 : i32, i32
  }
  func.func @transform_2(%arg0: i32, %arg1: i32, %arg2: i32) -> (i32, i32) {
    %c0_i32 = arith.constant 0 : i32
    return %arg1, %arg2 : i32, i32
  }
  func.func @transform_3(%arg0: i32, %arg1: i32, %arg2: i32) -> (i32, i32) {
    %c0_i32 = arith.constant 0 : i32
    %c0_i32_0 = arith.constant 0 : i32
    return %arg0, %c0_i32 : i32, i32
  }
  func.func @transform_4(%arg0: i32, %arg1: i32, %arg2: i32) -> (i32, i32) {
    %c0_i32 = arith.constant 0 : i32
    %c0_i32_0 = arith.constant 0 : i32
    return %c0_i32, %arg1 : i32, i32
  }
  func.func @transform_5(%arg0: i32, %arg1: i32, %arg2: i32) -> (i32, i32) {
    %c0_i32 = arith.constant 0 : i32
    return %arg0, %arg1 : i32, i32
  }
}

module attributes {stable_mosaic.version = 11 : i64} {
  func.func @_exp_kernel(%arg0: i32, %arg1: i32, %arg2: memref<1xf32, #tpu.memory_space<smem>>, %arg3: memref<16x128xf32, #tpu.memory_space<vmem>>, %arg4: memref<16x128xf32, #tpu.memory_space<vmem>>) attributes {dimension_semantics = [#tpu.dimension_semantics<parallel>, #tpu.dimension_semantics<parallel>], iteration_bounds = array<i64: 1, 1>, scalar_prefetch = 0 : i64, scratch_operands = 0 : i64, tpu.core_type = #tpu.core_type<tc>, window_params = [{transform_indices = @transform_0, window_bounds = array<i64: 1>}, {transform_indices = @transform_1, window_bounds = array<i64: 16, 128>}, {transform_indices = @transform_2, window_bounds = array<i64: 16, 128>}]} {
    %c0 = arith.constant 0 : index
    %0 = memref.load %arg2[%c0] : memref<1xf32, #tpu.memory_space<smem>>
    %cst = arith.constant 0.000000e+00 : f32
    %1 = arith.subf %cst, %0 : f32
    %c0_0 = arith.constant 0 : index
    %c0_1 = arith.constant 0 : index
    %2 = vector.load %arg3[%c0_0, %c0_1] : memref<16x128xf32, #tpu.memory_space<vmem>>, vector<16x128xf32>
    %3 = vector.broadcast %1 : f32 to vector<16x128xf32>
    %4 = arith.mulf %3, %2 : vector<16x128xf32>
    %5 = math.exp %4 : vector<16x128xf32>
    %c0_2 = arith.constant 0 : index
    %c0_3 = arith.constant 0 : index
    %6 = vector.load %arg4[%c0_2, %c0_3] : memref<16x128xf32, #tpu.memory_space<vmem>>, vector<16x128xf32>
    tpu.vector_store %arg4[%c0_2, %c0_3], %5 {strides = array<i32>} : memref<16x128xf32, #tpu.memory_space<vmem>>, vector<16x128xf32>,
    return
  }
  func.func @transform_0(%arg0: i32, %arg1: i32) -> i32 {
    %c0_i32 = arith.constant 0 : i32
    %c0_i32_0 = arith.constant 0 : i32
    return %c0_i32 : i32
  }
  func.func @transform_1(%arg0: i32, %arg1: i32) -> (i32, i32) {
    %c0_i32 = arith.constant 0 : i32
    return %arg0, %arg1 : i32, i32
  }
  func.func @transform_2(%arg0: i32, %arg1: i32) -> (i32, i32) {
    %c0_i32 = arith.constant 0 : i32
    return %arg0, %arg1 : i32, i32
  }
}

</mosaic_0001>

<bundles_post_ra>
// kernel: rbf_forward.3
= control target key start
LH: loop header
LB: loop body
LE: loop exit
PB: predicated region body
PF: predicated region fallthrough
CT: control target
= control target key end

     0   :  { %s63_s0 = inlined_call_operand.<no memory space> [shape: f32[1], index: 0, kind: input, shape index: {}]   ;;  %s64_s1 = inlined_call_operand.vmem [shape: f32[16,128], index: 1, kind: input, shape index: {}, may-alias: {1,2}]   ;;  %s65_s2 = inlined_call_operand.vmem [shape: f32[16,128], index: 2, kind: output, shape index: {}, may-alias: {1,2}]  }
   0x1   :  { %s13_s11 = ssub.f32 0.0, %s63_s0  ;;  %v14_v0 = vld [vmem:[%s64_s1] sm:$0xff]  ;;  %v15_v1 = vld [vmem:[%s64_s1 + $0x8] sm:$0xff] }
   0x3   :  { %v16_v2 = vstv %s13_s11 }
   0x4   :  { %v17_v3 = vmul.f32 %v16_v2, %v14_v0  ;;  %v18_v4 = vmul.f32 %v16_v2, %v15_v1 }
   0x6   :  { %v19_v5 = vmul.f32 1.442695, %v17_v3  ;;  %v21_v6 = vmul.f32 1.442695, %v18_v4 }
   0x8   :  { %29 = vpow2.f32 %v19_v5 }
   0x9   :  { %31 = vpow2.f32 %v21_v6 }
  0x12   :  { %v30_v7 = vpop.eup %29 }
  0x13   :  { %v32_v8 = vpop.eup %31  ;;  %23 = vst [vmem:[%s65_s2] sm:$0xff] %v30_v7 }
  0x14   :  { %24 = vst [vmem:[%s65_s2 + $0x8] sm:$0xff] %v32_v8 }

// kernel: rbf_forward.2
= control target key start
LH: loop header
LB: loop body
LE: loop exit
PB: predicated region body
PF: predicated region fallthrough
CT: control target
= control target key end

     0   :  { %v232_v3 = vmov 0   ;;  %s386_s0 = inlined_call_operand.<no memory space> [shape: f32[1], index: 0, kind: input, shape index: {}]   ;;  %s387_s2 = inlined_call_operand.vmem [shape: f32[128,256], index: 2, kind: input, shape index: {}]   ;;  %s388_s1 = inlined_call_operand.vmem [shape: f32[16,256], index: 1, kind: input, shape index: {}]   ;;  %s389_s3 = inlined_call_operand.vmem [shape: f32[16,1], index: 3, kind: input, shape index: {}]   ;;  %s390_s4 = inlined_call_operand.vmem [shape: f32[1,128], index: 4, kind: input, shape index: {}]   ;;  %s391_s5 = inlined_call_operand.vmem [shape: f32[16,128], index: 5, kind: output, shape index: {}]  }
   0x1   :  { %v32_v0 = vld [vmem:[%s387_s2 + $0x8] sm:$0xff]  ;;  %v34_v1 = vld [vmem:[%s387_s2 + $0x18] sm:$0xff]  ;;  %v31_v2 = vld [vmem:[%s387_s2] sm:$0xff]  ;;  %231 = vset.pattern.permute.xlu0 %v232_v3 }
   0x2   :  { %v181_v4 = vpack.c.bf16 %v34_v1, %v32_v0  ;;  %v33_v5 = vld [vmem:[%s387_s2 + $0x10] sm:$0xff]  ;;  %v36_v6 = vld [vmem:[%s387_s2 + $0x28] sm:$0xff]  ;;  %v38_v7 = vld [vmem:[%s387_s2 + $0x38] sm:$0xff] }
   0x3   :  { %v183_v8 = vpack.c.bf16 %v33_v5, %v31_v2  ;;  %v185_v9 = vpack.c.bf16 %v38_v7, %v36_v6  ;;  %v35_v10 = vld [vmem:[%s387_s2 + $0x20] sm:$0xff]  ;;  %v37_v11 = vld [vmem:[%s387_s2 + $0x30] sm:$0xff]  ;;  %v40_v12 = vld [vmem:[%s387_s2 + $0x48] sm:$0xff] }
   0x4   :  { %182 = vmatprep.subr.bf16.mxu0 %v181_v4  ;;  %213 = vmatprep.subr.bf16.mxu1 %v181_v4  ;;  %v42_v13 = vld [vmem:[%s387_s2 + $0x58] sm:$0xff]  ;;  %v187_v14 = vpack.c.bf16 %v37_v11, %v35_v10  ;;  %v28_v16 = vld [vmem:[%s388_s1 + $0x8] sm:$0xff]  ;;  %v149_v18 = vld [vmem:[%s389_s3] sm:$0xff] }
   0x5   :  { %184 = vmatpush1.bf16.xpose.msra.mxu0 %v183_v8  ;;  %221 = vmatpush1.bf16.xpose.msra.mxu1 %v183_v8  ;;  %v189_v15 = vpack.c.bf16 %v42_v13, %v40_v12  ;;  %v30_v17 = vld [vmem:[%s388_s1 + $0x18] sm:$0xff]  ;;  %v39_v19 = vld [vmem:[%s387_s2 + $0x40] sm:$0xff]  ;;  %v41_v20 = vld [vmem:[%s387_s2 + $0x50] sm:$0xff] }
   0x6   :  { %186 = vmatprep.subr.bf16.mxu0 %v185_v9  ;;  %214 = vmatprep.subr.bf16.mxu1 %v185_v9  ;;  %v44_v21 = vld [vmem:[%s387_s2 + $0x68] sm:$0xff]  ;;  %v46_v22 = vld [vmem:[%s387_s2 + $0x78] sm:$0xff]  ;;  %v191_v24 = vpack.c.bf16 %v41_v20, %v39_v19  ;;  %v43_v26 = vld [vmem:[%s387_s2 + $0x60] sm:$0xff] }
   0x7   :  { %129 = vmatprep.mubr.f32.mxu0 %v28_v16  ;;  %134 = vmatprep.mubr.f32.mxu1 %v30_v17  ;;  %v150_v23 = vld [vmem:[%s389_s3 + $0x8] sm:$0xff]  ;;  %v193_v25 = vpack.c.bf16 %v46_v22, %v44_v21  ;;  %v45_v27 = vld [vmem:[%s387_s2 + $0x70] sm:$0xff]  ;;  %v50_v29 = vld [vmem:[%s387_s2 + $0x98] sm:$0xff] }
   0x8   :  { %156 = vperm.xlu0 %231, %v149_v18   ;;  %v48_v28 = vld [vmem:[%s387_s2 + $0x88] sm:$0xff]  ;;  %v195_v30 = vpack.c.bf16 %v45_v27, %v43_v26  ;;  %v47_v32 = vld [vmem:[%s387_s2 + $0x80] sm:$0xff]  ;;  %v49_v33 = vld [vmem:[%s387_s2 + $0x90] sm:$0xff] }
   0x9   :  { %v197_v31 = vpack.c.bf16 %v50_v29, %v48_v28  ;;  %v52_v34 = vld [vmem:[%s387_s2 + $0xa8] sm:$0xff]  ;;  %v54_v35 = vld [vmem:[%s387_s2 + $0xb8] sm:$0xff]  ;;  %v199_v36 = vpack.c.bf16 %v49_v33, %v47_v32  ;;  %v51_v38 = vld [vmem:[%s387_s2 + $0xa0] sm:$0xff] }
   0xa   :  { %v201_v37 = vpack.c.bf16 %v54_v35, %v52_v34  ;;  %v53_v39 = vld [vmem:[%s387_s2 + $0xb0] sm:$0xff]  ;;  %v56_v40 = vld [vmem:[%s387_s2 + $0xc8] sm:$0xff]  ;;  %v58_v41 = vld [vmem:[%s387_s2 + $0xd8] sm:$0xff] }
   0xb   :  { %v203_v42 = vpack.c.bf16 %v53_v39, %v51_v38  ;;  %v205_v43 = vpack.c.bf16 %v58_v41, %v56_v40  ;;  %v55_v44 = vld [vmem:[%s387_s2 + $0xc0] sm:$0xff]  ;;  %v57_v45 = vld [vmem:[%s387_s2 + $0xd0] sm:$0xff]  ;;  %v60_v46 = vld [vmem:[%s387_s2 + $0xe8] sm:$0xff] }
   0xc   :  { %161 = vperm.xlu0 %231, %v150_v23   ;;  %v62_v47 = vld [vmem:[%s387_s2 + $0xf8] sm:$0xff]  ;;  %v207_v48 = vpack.c.bf16 %v57_v45, %v55_v44  ;;  %v59_v50 = vld [vmem:[%s387_s2 + $0xe0] sm:$0xff]  ;;  %v61_v51 = vld [vmem:[%s387_s2 + $0xf0] sm:$0xff] }
   0xd   :  { %188 = vmatpush1.bf16.xpose.msra.mxu0 %v187_v14  ;;  %222 = vmatpush1.bf16.xpose.msra.mxu1 %v187_v14  ;;  %v209_v49 = vpack.c.bf16 %v62_v47, %v60_v46  ;;  %v211_v52 = vpack.c.bf16 %v61_v51, %v59_v50  ;;  %v27_v53 = vld [vmem:[%s388_s1] sm:$0xff]  ;;  %v29_v54 = vld [vmem:[%s388_s1 + $0x10] sm:$0xff] }
   0xe   :  { %190 = vmatprep.subr.bf16.mxu0 %v189_v15  ;;  %215 = vmatprep.subr.bf16.mxu1 %v189_v15  ;;  %v180_v62 = vld [vmem:[%s390_s4] ss:$0 sm:$0xff] }
  0x15   :  { %192 = vmatpush1.bf16.xpose.msra.mxu0 %v191_v24  ;;  %223 = vmatpush1.bf16.xpose.msra.mxu1 %v191_v24 }
  0x16   :  { %194 = vmatprep.subr.bf16.mxu0 %v193_v25  ;;  %216 = vmatprep.subr.bf16.mxu1 %v193_v25 }
  0x1d   :  { %196 = vmatpush1.bf16.xpose.msra.mxu0 %v195_v30  ;;  %224 = vmatpush1.bf16.xpose.msra.mxu1 %v195_v30 }
  0x1e   :  { %198 = vmatprep.subr.bf16.mxu0 %v197_v31  ;;  %217 = vmatprep.subr.bf16.mxu1 %v197_v31 }
  0x25   :  { %200 = vmatpush1.bf16.xpose.msra.mxu0 %v199_v36  ;;  %225 = vmatpush1.bf16.xpose.msra.mxu1 %v199_v36 }
  0x26   :  { %202 = vmatprep.subr.bf16.mxu0 %v201_v37  ;;  %218 = vmatprep.subr.bf16.mxu1 %v201_v37 }
  0x2d   :  { %204 = vmatpush1.bf16.xpose.msra.mxu0 %v203_v42  ;;  %226 = vmatpush1.bf16.xpose.msra.mxu1 %v203_v42 }
  0x2e   :  { %206 = vmatprep.subr.bf16.mxu0 %v205_v43  ;;  %219 = vmatprep.subr.bf16.mxu1 %v205_v43 }
  0x35   :  { %208 = vmatpush1.bf16.xpose.msra.mxu0 %v207_v48  ;;  %227 = vmatpush1.bf16.xpose.msra.mxu1 %v207_v48 }
  0x36   :  { %210 = vmatprep.subr.bf16.mxu0 %v209_v49  ;;  %220 = vmatprep.subr.bf16.mxu1 %v209_v49 }
  0x3d   :  { %212 = vmatpush1.bf16.xpose.msra.mxu0 %v211_v52  ;;  %228 = vmatpush1.bf16.xpose.msra.mxu1 %v211_v52 }
  0x44   :  { %130 = vmatmul.mubr.f32.vlgmr.msra.gmra.mrb[0].mxu0 %v27_v53  ;;  %135 = vmatmul.mubr.f32.vlgmr.msra.gmra.mrb[0].mxu1 %v29_v54 }
  0x87   :  { %v157_v55 = vpop.permute.xlu0 %156 }
  0x8b   :  { %v162_v63 = vpop.permute.xlu0 %161 }
 0x117   :  { %v131_v56 = vpop.f32.mrb[0].mxu0  ;;  %v136_v57 = vpop.f32.mrb[0].mxu1 }
 0x118   :  { %v133_v58 = vpop.f32.mrb[1].mxu0  ;;  %v138_v59 = vpop.f32.mrb[1].mxu1  ;;  %v152_v60 = vmul.f32 2.0, %v131_v56  ;;  %v153_v61 = vmul.f32 2.0, %v136_v57 }
 0x11a   :  { %v164_v0 = vsub.f32 %v157_v55, %v152_v60  ;;  %v165_v1 = vsub.f32 %v162_v63, %v153_v61 }
 0x11c   :  { %v172_v2 = vadd.f32 %v180_v62, %v164_v0  ;;  %v173_v3 = vadd.f32 %v180_v62, %v165_v1 }
 0x11e   :  { %174 = vst [vmem:[%s391_s5] sm:$0xff] %v172_v2  ;;  %175 = vst [vmem:[%s391_s5 + $0x8] sm:$0xff] %v173_v3 }

</bundles_post_ra>
